<compile_context>
chip_gen: v5e
topology: v5e:2x2
jax: 0.10.0
libtpu: 0.0.40
codegen_flags: <defaults>
</compile_context>

<pallas_src>
import functools
from math import sqrt

import jax
import jax.numpy as jnp
from jax.experimental import pallas as pl
from jax.experimental.pallas import tpu as pltpu


# ----------------------------- helpers ----------------------------------------

def _round_up(x, m):
    return ((x + m - 1) // m) * m


def _padded_bytes(shape, dtype):
    """Rough (8,128)-padded VMEM footprint of one block."""
    shape = list(shape)
    if len(shape) >= 1:
        shape[-1] = _round_up(shape[-1], 128)
    if len(shape) >= 2:
        shape[-2] = _round_up(shape[-2], 8)
    size = 1
    for d in shape:
        size *= d
    return size * jnp.dtype(dtype).itemsize


def _vmem_limit(estimate_bytes):
    """Scoped-VMEM limit sized from the block footprint, clamped to [32 MiB, 64 MiB]."""
    return int(min(64 * 1024 * 1024,
                   max(32 * 1024 * 1024, 2 * estimate_bytes + (4 << 20))))


def _choose_tile(dim, preferred, align):
    """Largest multiple of `align` that divides `dim` and is <= preferred;
    full `dim` if none exists or dim <= preferred (full-extent blocks are always legal)."""
    if dim <= preferred:
        return dim
    best = None
    t = align
    while t <= preferred:
        if dim % t == 0:
            best = t
        t += align
    return best if best is not None else dim


# ------------------- fused multi-output projection kernel ----------------------

def _fused_proj_kernel(x_ref, *refs, n_out, scales, compute_dtype):
    # refs = w_0..w_{n-1}, b_0..b_{n-1}  (inputs)
    #        o_0..o_{n-1}                (outputs)
    #        acc_0..acc_{n-1}            (f32 VMEM scratch accumulators)
    w_refs = refs[:n_out]
    b_refs = refs[n_out:2 * n_out]
    o_refs = refs[2 * n_out:3 * n_out]
    acc_refs = refs[3 * n_out:]

    @pl.when(pl.program_id(1) == 0)
    def _():
        for acc in acc_refs:
            acc[...] = jnp.zeros_like(acc)

    x = x_ref[...].astype(compute_dtype)
    for w_ref, acc in zip(w_refs, acc_refs):
        acc[...] += jnp.dot(x, w_ref[...].astype(compute_dtype),
                            preferred_element_type=jnp.float32)

    @pl.when(pl.program_id(1) == pl.num_programs(1) - 1)
    def _():
        for o_ref, acc, b_ref, s in zip(o_refs, acc_refs, b_refs, scales):
            y = acc[...] + b_ref[...]
            if s != 1.0:                       # static; fold e.g. 1/sqrt(E) into Q
                y = y * s
            o_ref[...] = y.astype(o_ref.dtype)


def pallas_fused_projection(x, weights, biases, scales=None, *,
                            out_dtype=jnp.float32, compute_dtype=jnp.float32,
                            tm=256, tk=512):
    """y_j = (x @ W_j + b_j) * scale_j for all j, reading x from HBM once."""
    M, K = x.shape
    n_out = len(weights)
    if scales is None:
        scales = (1.0,) * n_out
    Ns = [w.shape[1] for w in weights]

    tm = _choose_tile(M, tm, 8)
    tk = _choose_tile(K, tk, 128)
    grid = (M // tm, K // tk)

    in_specs = [pl.BlockSpec((tm, tk), lambda i, k: (i, k))]
    in_specs += [pl.BlockSpec((tk, n), lambda i, k: (k, 0)) for n in Ns]
    in_specs += [pl.BlockSpec((1, n), lambda i, k: (0, 0)) for n in Ns]
    out_specs = [pl.BlockSpec((tm, n), lambda i, k: (i, 0)) for n in Ns]
    out_shape = [jax.ShapeDtypeStruct((M, n), out_dtype) for n in Ns]
    scratch = [pltpu.VMEM((tm, n), jnp.float32) for n in Ns]

    est = 2 * _padded_bytes((tm, tk), x.dtype)
    for n, w in zip(Ns, weights):
        est += 2 * _padded_bytes((tk, n), w.dtype)
        est += 2 * _padded_bytes((1, n), jnp.float32)
        est += 2 * _padded_bytes((tm, n), out_dtype)
        est += _padded_bytes((tm, n), jnp.float32)

    kernel = functools.partial(_fused_proj_kernel, n_out=n_out,
                               scales=tuple(float(s) for s in scales),
                               compute_dtype=compute_dtype)
    result = pl.pallas_call(
        kernel,
        grid=grid,
        in_specs=in_specs,
        out_specs=out_specs,
        out_shape=out_shape,
        scratch_shapes=scratch,
        compiler_params=pltpu.CompilerParams(
            dimension_semantics=("parallel", "arbitrary"),
            vmem_limit_bytes=_vmem_limit(est)),
    )(x, *weights, *[b.reshape(1, -1) for b in biases])
    if not isinstance(result, (list, tuple)):
        result = [result]
    return list(result)


# ------------------- flash attention (S-tiled, no attn-weights output) ---------

def _flash_attn_kernel(q_ref, k_ref, v_ref, o_ref, m_ref, l_ref, acc_ref,
                       *, n_heads, e, dv, compute_dtype):
    # q_ref: [1, tL, H*E], k_ref: [1, tS, H*E], v_ref: [1, tS, H*Dv]
    # o_ref: [1, tL, H*Dv]; scratch: m/l [H, tL, 1] f32, acc [tL, H*Dv] f32.
    # Scale (1/sqrt(E)) is already folded into q by the projection.
    j = pl.program_id(2)

    @pl.when(j == 0)
    def _():
        m_ref[...] = jnp.full_like(m_ref, -jnp.inf)
        l_ref[...] = jnp.zeros_like(l_ref)
        acc_ref[...] = jnp.zeros_like(acc_ref)

    q = q_ref[0]
    k = k_ref[0]
    v = v_ref[0]
    for h in range(n_heads):                                  # static head loop
        qh = q[:, h * e:(h + 1) * e].astype(compute_dtype)
        kh = k[:, h * e:(h + 1) * e].astype(compute_dtype)
        vh = v[:, h * dv:(h + 1) * dv].astype(compute_dtype)
        # scores = qh @ kh^T (contract on last dims; no explicit transpose)
        s = jax.lax.dot_general(qh, kh, (((1,), (1,)), ((), ())),
                                preferred_element_type=jnp.float32)   # [tL, tS]
        m_prev = m_ref[h]                                      # [tL, 1]
        m_new = jnp.maximum(m_prev, jnp.max(s, axis=-1, keepdims=True))
        alpha = jnp.exp(m_prev - m_new)
        p = jnp.exp(s - m_new)
        l_ref[h] = alpha * l_ref[h] + jnp.sum(p, axis=-1, keepdims=True)
        pv = jnp.dot(p.astype(compute_dtype), vh,
                     preferred_element_type=jnp.float32)               # [tL, Dv]
        acc_ref[:, h * dv:(h + 1) * dv] = (
            alpha * acc_ref[:, h * dv:(h + 1) * dv] + pv)
        m_ref[h] = m_new

    @pl.when(j == pl.num_programs(2) - 1)
    def _():
        for h in range(n_heads):
            inv = pl.reciprocal(l_ref[h], approx=False)        # EUP, not VPU divide
            acc_ref[:, h * dv:(h + 1) * dv] *= inv
        o_ref[0] = acc_ref[...].astype(o_ref.dtype)            # one lane-dense store


def pallas_flash_attention(q, k, v, *, n_heads, d_keys, d_values,
                           tl=128, ts=512, compute_dtype=jnp.float32,
                           out_dtype=jnp.float32):
    B, L, HE = q.shape
    S = k.shape[1]
    HDv = v.shape[2]
    tl = _choose_tile(L, tl, 8)
    ts = _choose_tile(S, ts, 8)
    grid = (B, L // tl, S // ts)

    est = (2 * (_padded_bytes((1, tl, HE), q.dtype)
                + _padded_bytes((1, ts, HE), k.dtype)
                + _padded_bytes((1, ts, HDv), v.dtype)
                + _padded_bytes((1, tl, HDv), out_dtype))
           + 2 * _padded_bytes((n_heads, tl, 1), jnp.float32)
           + _padded_bytes((tl, HDv), jnp.float32))

    kernel = functools.partial(_flash_attn_kernel, n_heads=n_heads, e=d_keys,
                               dv=d_values, compute_dtype=compute_dtype)
    out = pl.pallas_call(
        kernel,
        grid=grid,
        in_specs=[
            pl.BlockSpec((1, tl, HE), lambda b, i, j: (b, i, 0)),
            pl.BlockSpec((1, ts, HE), lambda b, i, j: (b, j, 0)),
            pl.BlockSpec((1, ts, HDv), lambda b, i, j: (b, j, 0)),
        ],
        out_specs=pl.BlockSpec((1, tl, HDv), lambda b, i, j: (b, i, 0)),
        out_shape=jax.ShapeDtypeStruct((B, L, HDv), out_dtype),
        scratch_shapes=[
            pltpu.VMEM((n_heads, tl, 1), jnp.float32),   # m
            pltpu.VMEM((n_heads, tl, 1), jnp.float32),   # l
            pltpu.VMEM((tl, HDv), jnp.float32),          # acc
        ],
        compiler_params=pltpu.CompilerParams(
            dimension_semantics=("parallel", "parallel", "arbitrary"),
            vmem_limit_bytes=_vmem_limit(est)),
    )(q, k, v)
    return out


# ------------------- full attention with attention-weights output --------------

def _attn_weights_kernel(q_ref, k_ref, v_ref, o_ref, a_ref, acc_ref,
                         *, n_heads, e, dv, compute_dtype):
    # q_ref: [1, tL, H*E], k_ref: [1, S, H*E], v_ref: [1, S, H*Dv]
    # o_ref: [1, tL, H*Dv]; a_ref: [1, H, tL, S]; acc scratch: [tL, H*Dv] f32
    q = q_ref[0]
    k = k_ref[0]
    v = v_ref[0]
    for h in range(n_heads):
        qh = q[:, h * e:(h + 1) * e].astype(compute_dtype)
        kh = k[:, h * e:(h + 1) * e].astype(compute_dtype)
        vh = v[:, h * dv:(h + 1) * dv].astype(compute_dtype)
        s = jax.lax.dot_general(qh, kh, (((1,), (1,)), ((), ())),
                                preferred_element_type=jnp.float32)   # [tL, S]
        m = jnp.max(s, axis=-1, keepdims=True)
        p = jnp.exp(s - m)
        inv = pl.reciprocal(jnp.sum(p, axis=-1, keepdims=True), approx=False)
        a = p * inv
        a_ref[0, h] = a.astype(a_ref.dtype)
        acc_ref[:, h * dv:(h + 1) * dv] = jnp.dot(
            a.astype(compute_dtype), vh, preferred_element_type=jnp.float32)
    o_ref[0] = acc_ref[...].astype(o_ref.dtype)


def pallas_attention_with_weights(q, k, v, *, n_heads, d_keys, d_values,
                                  tl=128, compute_dtype=jnp.float32,
                                  out_dtype=jnp.float32):
    # Only used when the caller explicitly requests the [B,H,L,S] attention matrix.
    B, L, HE = q.shape
    S = k.shape[1]
    HDv = v.shape[2]
    tl = _choose_tile(L, tl, 8)
    grid = (B, L // tl)

    est = (2 * (_padded_bytes((1, tl, HE), q.dtype)
                + _padded_bytes((1, S, HE), k.dtype)
                + _padded_bytes((1, S, HDv), v.dtype)
                + _padded_bytes((1, tl, HDv), out_dtype)
                + _padded_bytes((1, n_heads, tl, S), jnp.float32))
           + _padded_bytes((tl, HDv), jnp.float32))

    kernel = functools.partial(_attn_weights_kernel, n_heads=n_heads, e=d_keys,
                               dv=d_values, compute_dtype=compute_dtype)
    out, attn = pl.pallas_call(
        kernel,
        grid=grid,
        in_specs=[
            pl.BlockSpec((1, tl, HE), lambda b, i: (b, i, 0)),
            pl.BlockSpec((1, S, HE), lambda b, i: (b, 0, 0)),
            pl.BlockSpec((1, S, HDv), lambda b, i: (b, 0, 0)),
        ],
        out_specs=[
            pl.BlockSpec((1, tl, HDv), lambda b, i: (b, i, 0)),
            pl.BlockSpec((1, n_heads, tl, S), lambda b, i: (b, 0, i, 0)),
        ],
        out_shape=[
            jax.ShapeDtypeStruct((B, L, HDv), out_dtype),
            jax.ShapeDtypeStruct((B, n_heads, L, S), jnp.float32),
        ],
        scratch_shapes=[pltpu.VMEM((tl, HDv), jnp.float32)],
        compiler_params=pltpu.CompilerParams(
            dimension_semantics=("parallel", "parallel"),
            vmem_limit_bytes=_vmem_limit(est)),
    )(q, k, v)
    return out, attn


# ----------------------------- module wrapper -----------------------------------

def init_params(key, d_model, n_heads, d_keys=None, d_values=None):
    d_keys = d_keys or d_model // n_heads
    d_values = d_values or d_model // n_heads
    keys = jax.random.split(key, 8)

    def lin(kw, kb, d_in, d_out):
        bound = 1.0 / sqrt(d_in)
        w = jax.random.uniform(kw, (d_in, d_out), jnp.float32, -bound, bound)
        b = jax.random.uniform(kb, (d_out,), jnp.float32, -bound, bound)
        return w, b

    wq, bq = lin(keys[0], keys[1], d_model, d_keys * n_heads)
    wk, bk = lin(keys[2], keys[3], d_model, d_keys * n_heads)
    wv, bv = lin(keys[4], keys[5], d_model, d_values * n_heads)
    wo, bo = lin(keys[6], keys[7], d_values * n_heads, d_model)
    return dict(wq=wq, bq=bq, wk=wk, bk=bk, wv=wv, bv=bv, wo=wo, bo=bo,
                n_heads=n_heads, d_keys=d_keys, d_values=d_values)


def attention_layer_forward(params, queries, keys, values, attn_mask=None, *,
                            fuse_qkv=False, fuse_kv=False, output_attention=True,
                            compute_dtype=jnp.float32):
    # TODO(synk): attn_mask is ignored (FullAttention mask_flag=False / attn_mask=None path).
    B, L, d_model = queries.shape
    S = keys.shape[1]
    H, E, Dv = params["n_heads"], params["d_keys"], params["d_values"]
    HE, HDv = H * E, H * Dv
    q_scale = 1.0 / sqrt(E)
    # bf16 intermediates halve HBM traffic when the MXU runs bf16; softmax stays f32.
    inter_dtype = jnp.bfloat16 if compute_dtype == jnp.bfloat16 else jnp.float32

    # Static flags control fusion (object identity kept only as an eager convenience).
    fuse_qkv = fuse_qkv or (queries is keys and keys is values)
    fuse_kv = fuse_kv or (keys is values)

    xq = queries.reshape(B * L, d_model)
    if fuse_qkv:
        q, k, v = pallas_fused_projection(
            xq,
            (params["wq"], params["wk"], params["wv"]),
            (params["bq"], params["bk"], params["bv"]),
            scales=(q_scale, 1.0, 1.0),
            out_dtype=inter_dtype, compute_dtype=compute_dtype)
    else:
        (q,) = pallas_fused_projection(
            xq, (params["wq"],), (params["bq"],), scales=(q_scale,),
            out_dtype=inter_dtype, compute_dtype=compute_dtype)
        xkv = keys.reshape(B * S, d_model)
        if fuse_kv:
            k, v = pallas_fused_projection(
                xkv, (params["wk"], params["wv"]), (params["bk"], params["bv"]),
                out_dtype=inter_dtype, compute_dtype=compute_dtype)
        else:
            (k,) = pallas_fused_projection(
                xkv, (params["wk"],), (params["bk"],),
                out_dtype=inter_dtype, compute_dtype=compute_dtype)
            (v,) = pallas_fused_projection(
                values.reshape(B * S, d_model), (params["wv"],), (params["bv"],),
                out_dtype=inter_dtype, compute_dtype=compute_dtype)

    q = q.reshape(B, L, HE)
    k = k.reshape(B, S, HE)
    v = v.reshape(B, S, HDv)

    if output_attention:
        out, attn = pallas_attention_with_weights(
            q, k, v, n_heads=H, d_keys=E, d_values=Dv,
            compute_dtype=compute_dtype, out_dtype=inter_dtype)
    else:
        out = pallas_flash_attention(
            q, k, v, n_heads=H, d_keys=E, d_values=Dv,
            compute_dtype=compute_dtype, out_dtype=inter_dtype)
        attn = None

    # out is already the lane-dense [B, L, H*Dv] slab (== torch .view(B, L, -1)).
    (y,) = pallas_fused_projection(
        out.reshape(B * L, HDv), (params["wo"],), (params["bo"],),
        out_dtype=jnp.float32, compute_dtype=compute_dtype)
    return y.reshape(B, L, d_model), attn


# ----------------------------- references (plain JAX) ----------------------------

def reference_forward(params, queries, keys, values):
    B, L, d_model = queries.shape
    _, S, _ = keys.shape
    H, E, Dv = params["n_heads"], params["d_keys"], params["d_values"]
    q = (queries @ params["wq"] + params["bq"]).reshape(B, L, H, E)
    k = (keys @ params["wk"] + params["bk"]).reshape(B, S, H, E)
    v = (values @ params["wv"] + params["bv"]).reshape(B, S, H, Dv)
    scores = jnp.einsum("blhe,bshe->bhls", q, k) / sqrt(E)
    attn = jax.nn.softmax(scores, axis=-1)
    out = jnp.einsum("bhls,bshd->blhd", attn, v).reshape(B, L, H * Dv)
    return out @ params["wo"] + params["bo"], attn


def reference_attention_flat(q, k, v, n_heads, e, dv):
    # q assumed pre-scaled (matches the kernel contract).
    B, L, _ = q.shape
    S = k.shape[1]
    qh = q.reshape(B, L, n_heads, e)
    kh = k.reshape(B, S, n_heads, e)
    vh = v.reshape(B, S, n_heads, dv)
    s = jnp.einsum("blhe,bshe->bhls", qh, kh)
    a = jax.nn.softmax(s, axis=-1)
    return jnp.einsum("bhls,bshd->blhd", a, vh).reshape(B, L, n_heads * dv)


# ----------------------------- main ---------------------------------------------

if __name__ == "__main__":
    B, L, S, d_model, n_heads = 2, 8, 8, 32, 4

    key = jax.random.PRNGKey(0)
    kp, kx, kk, kv, kq2, kk2, kv2 = jax.random.split(key, 7)
    params = init_params(kp, d_model, n_heads)
    H, E, Dv = params["n_heads"], params["d_keys"], params["d_values"]

    x = jax.random.normal(kx, (B, L, d_model), jnp.float32)

    # 1) self-attention, fused QKV projection, attention weights requested (f32 exact).
    y, attn = attention_layer_forward(params, x, x, x, attn_mask=None,
                                      fuse_qkv=True, output_attention=True)
    jax.block_until_ready((y, attn))
    y_ref, attn_ref = reference_forward(params, x, x, x)
    assert jnp.allclose(y, y_ref, atol=1e-4, rtol=1e-4), "self-attn output mismatch"
    assert jnp.allclose(attn, attn_ref, atol=1e-4, rtol=1e-4), "self-attn weights mismatch"

    # 2) self-attention, flash path (no attention-weights output), f32 exact.
    y_fl, attn_none = attention_layer_forward(params, x, x, x, attn_mask=None,
                                              fuse_qkv=True, output_attention=False)
    jax.block_until_ready(y_fl)
    assert attn_none is None
    assert jnp.allclose(y_fl, y_ref, atol=1e-4, rtol=1e-4), "flash self-attn output mismatch"

    # 3) cross-attention, separate projections, f32 exact.
    keys_in = jax.random.normal(kk, (B, S, d_model), jnp.float32)
    values_in = jax.random.normal(kv, (B, S, d_model), jnp.float32)
    y2, attn2 = attention_layer_forward(params, x, keys_in, values_in, attn_mask=None,
                                        output_attention=True)
    jax.block_until_ready((y2, attn2))
    y2_ref, attn2_ref = reference_forward(params, x, keys_in, values_in)
    assert jnp.allclose(y2, y2_ref, atol=1e-4, rtol=1e-4), "cross-attn output mismatch"
    assert jnp.allclose(attn2, attn2_ref, atol=1e-4, rtol=1e-4), "cross-attn weights mismatch"

    # 4) flash kernel with multiple KV grid steps (exercises the online softmax).
    L2, S2 = 16, 32
    q_fl = jax.random.normal(kq2, (B, L2, H * E), jnp.float32)
    k_fl = jax.random.normal(kk2, (B, S2, H * E), jnp.float32)
    v_fl = jax.random.normal(kv2, (B, S2, H * Dv), jnp.float32)
    o_fl = pallas_flash_attention(q_fl, k_fl, v_fl, n_heads=H, d_keys=E, d_values=Dv,
                                  tl=16, ts=8)
    jax.block_until_ready(o_fl)
    o_fl_ref = reference_attention_flat(q_fl, k_fl, v_fl, H, E, Dv)
    assert jnp.allclose(o_fl, o_fl_ref, atol=1e-4, rtol=1e-4), "online-softmax mismatch"

    # 5) bf16 MXU-operand mode (f32 accumulation / softmax), loose tolerance smoke test.
    y_bf, _ = attention_layer_forward(params, x, x, x, attn_mask=None,
                                      fuse_qkv=True, output_attention=False,
                                      compute_dtype=jnp.bfloat16)
    jax.block_until_ready(y_bf)
    assert jnp.allclose(y_bf, y_ref, atol=5e-2, rtol=5e-2), "bf16 path output mismatch"

    print("KERNEL_OK")
</pallas_src>

<mosaic_0001>
module attributes {stable_mosaic.version = 11 : i64} {
  func.func @_fused_proj_kernel(%arg0: i32, %arg1: i32, %arg2: memref<16x32xf32, #tpu.memory_space<vmem>>, %arg3: memref<32x32xf32, #tpu.memory_space<vmem>>, %arg4: memref<32x32xf32, #tpu.memory_space<vmem>>, %arg5: memref<32x32xf32, #tpu.memory_space<vmem>>, %arg6: memref<1x32xf32, #tpu.memory_space<vmem>>, %arg7: memref<1x32xf32, #tpu.memory_space<vmem>>, %arg8: memref<1x32xf32, #tpu.memory_space<vmem>>, %arg9: memref<16x32xf32, #tpu.memory_space<vmem>>, %arg10: memref<16x32xf32, #tpu.memory_space<vmem>>, %arg11: memref<16x32xf32, #tpu.memory_space<vmem>>, %arg12: memref<16x32xf32, #tpu.memory_space<vmem>>, %arg13: memref<16x32xf32, #tpu.memory_space<vmem>>, %arg14: memref<16x32xf32, #tpu.memory_space<vmem>>) attributes {dimension_semantics = [#tpu.dimension_semantics<parallel>, #tpu.dimension_semantics<arbitrary>], iteration_bounds = array<i64: 1, 1>, scalar_prefetch = 0 : i64, scratch_operands = 3 : i64, tpu.core_type = #tpu.core_type<tc>, window_params = [{transform_indices = @transform_0, window_bounds = array<i64: 16, 32>}, {transform_indices = @transform_1, window_bounds = array<i64: 32, 32>}, {transform_indices = @transform_2, window_bounds = array<i64: 32, 32>}, {transform_indices = @transform_3, window_bounds = array<i64: 32, 32>}, {pipeline_mode = #tpu.pipeline_mode<synchronous>, transform_indices = @transform_4, window_bounds = array<i64: 1, 32>}, {pipeline_mode = #tpu.pipeline_mode<synchronous>, transform_indices = @transform_5, window_bounds = array<i64: 1, 32>}, {pipeline_mode = #tpu.pipeline_mode<synchronous>, transform_indices = @transform_6, window_bounds = array<i64: 1, 32>}, {transform_indices = @transform_7, window_bounds = array<i64: 16, 32>}, {transform_indices = @transform_8, window_bounds = array<i64: 16, 32>}, {transform_indices = @transform_9, window_bounds = array<i64: 16, 32>}]} {
    %c0_i32 = arith.constant 0 : i32
    %0 = arith.cmpi eq, %arg1, %c0_i32 : i32
    %1 = arith.extui %0 : i1 to i32
    %c0_i32_0 = arith.constant 0 : i32
    %2 = arith.cmpi ne, %1, %c0_i32_0 : i32
    scf.if %2 {
      %cst_24 = arith.constant 0.000000e+00 : f32
      %22 = vector.broadcast %cst_24 : f32 to vector<16x32xf32>
      %c0_25 = arith.constant 0 : index
      %c0_26 = arith.constant 0 : index
      %23 = vector.load %arg12[%c0_25, %c0_26] : memref<16x32xf32, #tpu.memory_space<vmem>>, vector<16x32xf32>
      tpu.vector_store %arg12[%c0_25, %c0_26], %22 {strides = array<i32>} : memref<16x32xf32, #tpu.memory_space<vmem>>, vector<16x32xf32>,
      %cst_27 = arith.constant 0.000000e+00 : f32
      %24 = vector.broadcast %cst_27 : f32 to vector<16x32xf32>
      %c0_28 = arith.constant 0 : index
      %c0_29 = arith.constant 0 : index
      %25 = vector.load %arg13[%c0_28, %c0_29] : memref<16x32xf32, #tpu.memory_space<vmem>>, vector<16x32xf32>
      tpu.vector_store %arg13[%c0_28, %c0_29], %24 {strides = array<i32>} : memref<16x32xf32, #tpu.memory_space<vmem>>, vector<16x32xf32>,
      %cst_30 = arith.constant 0.000000e+00 : f32
      %26 = vector.broadcast %cst_30 : f32 to vector<16x32xf32>
      %c0_31 = arith.constant 0 : index
      %c0_32 = arith.constant 0 : index
      %27 = vector.load %arg14[%c0_31, %c0_32] : memref<16x32xf32, #tpu.memory_space<vmem>>, vector<16x32xf32>
      tpu.vector_store %arg14[%c0_31, %c0_32], %26 {strides = array<i32>} : memref<16x32xf32, #tpu.memory_space<vmem>>, vector<16x32xf32>,
    } else {
    }
    %c0 = arith.constant 0 : index
    %c0_1 = arith.constant 0 : index
    %3 = vector.load %arg2[%c0, %c0_1] : memref<16x32xf32, #tpu.memory_space<vmem>>, vector<16x32xf32>
    %c0_2 = arith.constant 0 : index
    %c0_3 = arith.constant 0 : index
    %4 = vector.load %arg12[%c0_2, %c0_3] : memref<16x32xf32, #tpu.memory_space<vmem>>, vector<16x32xf32>
    %c0_4 = arith.constant 0 : index
    %c0_5 = arith.constant 0 : index
    %5 = vector.load %arg3[%c0_4, %c0_5] : memref<32x32xf32, #tpu.memory_space<vmem>>, vector<32x32xf32>
    %cst = arith.constant dense<0.000000e+00> : vector<16x32xf32>
    %6 = tpu.matmul %3, %5, %cst {dimension_numbers = #tpu.dot_dimension_numbers<[1], [0], [0], [1], [0, 0, 1, 1], [], []>} : vector<16x32xf32>, vector<32x32xf32>, vector<16x32xf32> -> vector<16x32xf32>
    %7 = arith.addf %4, %6 : vector<16x32xf32>
    %c0_6 = arith.constant 0 : index
    %c0_7 = arith.constant 0 : index
    %8 = vector.load %arg12[%c0_6, %c0_7] : memref<16x32xf32, #tpu.memory_space<vmem>>, vector<16x32xf32>
    tpu.vector_store %arg12[%c0_6, %c0_7], %7 {strides = array<i32>} : memref<16x32xf32, #tpu.memory_space<vmem>>, vector<16x32xf32>,
    %c0_8 = arith.constant 0 : index
    %c0_9 = arith.constant 0 : index
    %9 = vector.load %arg13[%c0_8, %c0_9] : memref<16x32xf32, #tpu.memory_space<vmem>>, vector<16x32xf32>
    %c0_10 = arith.constant 0 : index
    %c0_11 = arith.constant 0 : index
    %10 = vector.load %arg4[%c0_10, %c0_11] : memref<32x32xf32, #tpu.memory_space<vmem>>, vector<32x32xf32>
    %cst_12 = arith.constant dense<0.000000e+00> : vector<16x32xf32>
    %11 = tpu.matmul %3, %10, %cst_12 {dimension_numbers = #tpu.dot_dimension_numbers<[1], [0], [0], [1], [0, 0, 1, 1], [], []>} : vector<16x32xf32>, vector<32x32xf32>, vector<16x32xf32> -> vector<16x32xf32>
    %12 = arith.addf %9, %11 : vector<16x32xf32>
    %c0_13 = arith.constant 0 : index
    %c0_14 = arith.constant 0 : index
    %13 = vector.load %arg13[%c0_13, %c0_14] : memref<16x32xf32, #tpu.memory_space<vmem>>, vector<16x32xf32>
    tpu.vector_store %arg13[%c0_13, %c0_14], %12 {strides = array<i32>} : memref<16x32xf32, #tpu.memory_space<vmem>>, vector<16x32xf32>,
    %c0_15 = arith.constant 0 : index
    %c0_16 = arith.constant 0 : index
    %14 = vector.load %arg14[%c0_15, %c0_16] : memref<16x32xf32, #tpu.memory_space<vmem>>, vector<16x32xf32>
    %c0_17 = arith.constant 0 : index
    %c0_18 = arith.constant 0 : index
    %15 = vector.load %arg5[%c0_17, %c0_18] : memref<32x32xf32, #tpu.memory_space<vmem>>, vector<32x32xf32>
    %cst_19 = arith.constant dense<0.000000e+00> : vector<16x32xf32>
    %16 = tpu.matmul %3, %15, %cst_19 {dimension_numbers = #tpu.dot_dimension_numbers<[1], [0], [0], [1], [0, 0, 1, 1], [], []>} : vector<16x32xf32>, vector<32x32xf32>, vector<16x32xf32> -> vector<16x32xf32>
    %17 = arith.addf %14, %16 : vector<16x32xf32>
    %c0_20 = arith.constant 0 : index
    %c0_21 = arith.constant 0 : index
    %18 = vector.load %arg14[%c0_20, %c0_21] : memref<16x32xf32, #tpu.memory_space<vmem>>, vector<16x32xf32>
    tpu.vector_store %arg14[%c0_20, %c0_21], %17 {strides = array<i32>} : memref<16x32xf32, #tpu.memory_space<vmem>>, vector<16x32xf32>,
    %c0_i32_22 = arith.constant 0 : i32
    %19 = arith.cmpi eq, %arg1, %c0_i32_22 : i32
    %20 = arith.extui %19 : i1 to i32
    %c0_i32_23 = arith.constant 0 : i32
    %21 = arith.cmpi ne, %20, %c0_i32_23 : i32
    scf.if %21 {
      %c0_24 = arith.constant 0 : index
      %c0_25 = arith.constant 0 : index
      %22 = vector.load %arg12[%c0_24, %c0_25] : memref<16x32xf32, #tpu.memory_space<vmem>>, vector<16x32xf32>
      %c0_26 = arith.constant 0 : index
      %c0_27 = arith.constant 0 : index
      %23 = vector.load %arg6[%c0_26, %c0_27] : memref<1x32xf32, #tpu.memory_space<vmem>>, vector<1x32xf32>
      %24 = vector.broadcast %23 : vector<1x32xf32> to vector<16x32xf32>
      %25 = arith.addf %22, %24 : vector<16x32xf32>
      %cst_28 = arith.constant 0.353553385 : f32
      %26 = vector.broadcast %cst_28 : f32 to vector<16x32xf32>
      %27 = arith.mulf %25, %26 : vector<16x32xf32>
      %c0_29 = arith.constant 0 : index
      %c0_30 = arith.constant 0 : index
      %28 = vector.load %arg9[%c0_29, %c0_30] : memref<16x32xf32, #tpu.memory_space<vmem>>, vector<16x32xf32>
      tpu.vector_store %arg9[%c0_29, %c0_30], %27 {strides = array<i32>} : memref<16x32xf32, #tpu.memory_space<vmem>>, vector<16x32xf32>,
      %c0_31 = arith.constant 0 : index
      %c0_32 = arith.constant 0 : index
      %29 = vector.load %arg13[%c0_31, %c0_32] : memref<16x32xf32, #tpu.memory_space<vmem>>, vector<16x32xf32>
      %c0_33 = arith.constant 0 : index
      %c0_34 = arith.constant 0 : index
      %30 = vector.load %arg7[%c0_33, %c0_34] : memref<1x32xf32, #tpu.memory_space<vmem>>, vector<1x32xf32>
      %31 = vector.broadcast %30 : vector<1x32xf32> to vector<16x32xf32>
      %32 = arith.addf %29, %31 : vector<16x32xf32>
      %c0_35 = arith.constant 0 : index
      %c0_36 = arith.constant 0 : index
      %33 = vector.load %arg10[%c0_35, %c0_36] : memref<16x32xf32, #tpu.memory_space<vmem>>, vector<16x32xf32>
      tpu.vector_store %arg10[%c0_35, %c0_36], %32 {strides = array<i32>} : memref<16x32xf32, #tpu.memory_space<vmem>>, vector<16x32xf32>,
      %c0_37 = arith.constant 0 : index
      %c0_38 = arith.constant 0 : index
      %34 = vector.load %arg14[%c0_37, %c0_38] : memref<16x32xf32, #tpu.memory_space<vmem>>, vector<16x32xf32>
      %c0_39 = arith.constant 0 : index
      %c0_40 = arith.constant 0 : index
      %35 = vector.load %arg8[%c0_39, %c0_40] : memref<1x32xf32, #tpu.memory_space<vmem>>, vector<1x32xf32>
      %36 = vector.broadcast %35 : vector<1x32xf32> to vector<16x32xf32>
      %37 = arith.addf %34, %36 : vector<16x32xf32>
      %c0_41 = arith.constant 0 : index
      %c0_42 = arith.constant 0 : index
      %38 = vector.load %arg11[%c0_41, %c0_42] : memref<16x32xf32, #tpu.memory_space<vmem>>, vector<16x32xf32>
      tpu.vector_store %arg11[%c0_41, %c0_42], %37 {strides = array<i32>} : memref<16x32xf32, #tpu.memory_space<vmem>>, vector<16x32xf32>,
    } else {
    }
    return
  }
  func.func @transform_0(%arg0: i32, %arg1: i32) -> (i32, i32) {
    %c0_i32 = arith.constant 0 : i32
    return %arg0, %arg1 : i32, i32
  }
  func.func @transform_1(%arg0: i32, %arg1: i32) -> (i32, i32) {
    %c0_i32 = arith.constant 0 : i32
    %c0_i32_0 = arith.constant 0 : i32
    return %arg1, %c0_i32 : i32, i32
  }
  func.func @transform_2(%arg0: i32, %arg1: i32) -> (i32, i32) {
    %c0_i32 = arith.constant 0 : i32
    %c0_i32_0 = arith.constant 0 : i32
    return %arg1, %c0_i32 : i32, i32
  }
  func.func @transform_3(%arg0: i32, %arg1: i32) -> (i32, i32) {
    %c0_i32 = arith.constant 0 : i32
    %c0_i32_0 = arith.constant 0 : i32
    return %arg1, %c0_i32 : i32, i32
  }
  func.func @transform_4(%arg0: i32, %arg1: i32) -> (i32, i32) {
    %c0_i32 = arith.constant 0 : i32
    %c0_i32_0 = arith.constant 0 : i32
    %c0_i32_1 = arith.constant 0 : i32
    return %c0_i32, %c0_i32_0 : i32, i32
  }
  func.func @transform_5(%arg0: i32, %arg1: i32) -> (i32, i32) {
    %c0_i32 = arith.constant 0 : i32
    %c0_i32_0 = arith.constant 0 : i32
    %c0_i32_1 = arith.constant 0 : i32
    return %c0_i32, %c0_i32_0 : i32, i32
  }
  func.func @transform_6(%arg0: i32, %arg1: i32) -> (i32, i32) {
    %c0_i32 = arith.constant 0 : i32
    %c0_i32_0 = arith.constant 0 : i32
    %c0_i32_1 = arith.constant 0 : i32
    return %c0_i32, %c0_i32_0 : i32, i32
  }
  func.func @transform_7(%arg0: i32, %arg1: i32) -> (i32, i32) {
    %c0_i32 = arith.constant 0 : i32
    %c0_i32_0 = arith.constant 0 : i32
    return %arg0, %c0_i32 : i32, i32
  }
  func.func @transform_8(%arg0: i32, %arg1: i32) -> (i32, i32) {
    %c0_i32 = arith.constant 0 : i32
    %c0_i32_0 = arith.constant 0 : i32
    return %arg0, %c0_i32 : i32, i32
  }
  func.func @transform_9(%arg0: i32, %arg1: i32) -> (i32, i32) {
    %c0_i32 = arith.constant 0 : i32
    %c0_i32_0 = arith.constant 0 : i32
    return %arg0, %c0_i32 : i32, i32
  }
}

</mosaic_0001>

<bundles_post_ra>
// kernel: tpu_custom_call.1
= control target key start
LH: loop header
LB: loop body
LE: loop exit
PB: predicated region body
PF: predicated region fallthrough
CT: control target
= control target key end

     0   :  { %15 = vsyncpa [#allocation6], 0  ;;  %s640_s0 = inlined_call_operand.hbm [shape: f32[16,32], index: 0, kind: input, shape index: {}]   ;;  %s641_s1 = inlined_call_operand.hbm [shape: f32[32,32], index: 1, kind: input, shape index: {}]   ;;  %s642_s2 = inlined_call_operand.hbm [shape: f32[32,32], index: 2, kind: input, shape index: {}]   ;;  %s643_s3 = inlined_call_operand.hbm [shape: f32[32,32], index: 3, kind: input, shape index: {}]   ;;  %s644_s4 = inlined_call_operand.vmem [shape: f32[1,32], index: 4, kind: input, shape index: {}]   ;;  %s645_s5 = inlined_call_operand.vmem [shape: f32[1,32], index: 5, kind: input, shape index: {}]   ;;  %s646_s6 = inlined_call_operand.vmem [shape: f32[1,32], index: 6, kind: input, shape index: {}]   ;;  %s647_s7 = inlined_call_operand.hbm [shape: f32[16,32], index: 7, kind: output, shape index: {0}]   ;;  %s648_s8 = inlined_call_operand.hbm [shape: f32[16,32], index: 8, kind: output, shape index: {1}]   ;;  %s649_s9 = inlined_call_operand.hbm [shape: f32[16,32], index: 9, kind: output, shape index: {2}]  }
   0x1   :  { %16 = vsyncpa [#allocation9], 0 }
   0x2   :  { %17 = vsyncpa [#allocation12], 0 }
   0x3   :  { %18 = vsyncpa [#allocation7], 0 }
   0x4   :  { %19 = vsyncpa [#allocation15], 0  ;;  %s37_s11 = sshll.u32 %s641_s1, 4  ;;  %s505_s12 = smov [#allocation8]   ;;  %s38_s11 = int_to_ptr.hbm [resolvable:$true] %s37_s11 }
   0x5   :  { %s39_s13 = sshll.u32 %s505_s12, 4  ;;  %s24_s16 = sshll.u32 %s640_s0, 4  ;;  %s40_s13 = int_to_ptr.vmem [resolvable:$true] %s39_s13  ;;  %s25_s16 = int_to_ptr.hbm [resolvable:$true] %s24_s16 }
   0x6   :  { %s506_s17 = smov 128   ;;  %s507_s18 = smov 8  }
   0x7   :  { %45 = dma.hbm_to_vmem [thread:$0]  %s38_s11, 512, %s40_s13, [#allocation9], %s506_s17, %s506_s17, %s507_s18  }
   0x8   :  { %s508_s19 = smov [#allocation5]   ;;  %s50_s1 = sshll.u32 %s642_s2, 4  ;;  %s51_s1 = int_to_ptr.hbm [resolvable:$true] %s50_s1 }
   0x9   :  { %s26_s20 = sshll.u32 %s508_s19, 4  ;;  %s63_s24 = sshll.u32 %s643_s3, 4  ;;  %s27_s20 = int_to_ptr.vmem [resolvable:$true] %s26_s20  ;;  %s64_s24 = int_to_ptr.hbm [resolvable:$true] %s63_s24 }
   0xa   :  { %32 = dma.hbm_to_vmem [thread:$0]  %s25_s16, 256, %s27_s20, [#allocation6], %s506_s17, %s506_s17, %s507_s18  }
   0xb   :  { %s509_s25 = smov [#allocation10]   ;;  %s510_s27 = smov [#allocation11]  }
   0xc   :  { %s52_s26 = sshll.u32 %s509_s25, 4  ;;  %s65_s2 = sshll.u32 %s510_s27, 4  ;;  %s53_s26 = int_to_ptr.vmem [resolvable:$true] %s52_s26  ;;  %s66_s2 = int_to_ptr.vmem [resolvable:$true] %s65_s2 }
   0xd   :  { %58 = dma.hbm_to_vmem [thread:$0]  %s51_s1, 512, %s53_s26, [#allocation9], %s506_s17, %s506_s17, %s507_s18  }
   0xe   :  { %71 = dma.hbm_to_vmem [thread:$0]  %s64_s24, 512, %s66_s2, [#allocation12], %s506_s17, %s506_s17, %s507_s18  }
   0xf   :  { %495 = dma.done.wait [#allocation6], 256  }
  0x10   :  { %496 = vsyncadd [#allocation6], 4294967040 }
  0x11   :  { %497 = dma.done.wait [#allocation9], 1024  }
  0x12   :  { %498 = vsyncadd [#allocation9], 4294966272 }
  0x13   :  { %499 = dma.done.wait [#allocation12], 512  }
  0x14   :  { %500 = vsyncadd [#allocation12], 4294966784  ;;  %vm98_vm0 = vcmask 261120   ;;  %v511_v0 = vmov 0.0   ;;  %v185_v1 = vld [vmem:[#allocation11 + $0x18] sm:$0xff]  ;;  %v184_v2 = vld [vmem:[#allocation11 + $0x10] sm:$0xff] }
  0x15   :  { %101 = vst.msk [vmem:[#allocation3] sm:$0xff] %vm98_vm0, %v511_v0  ;;  %198 = vmatpush.msra.mxu2 %v185_v1  ;;  %v152_v3 = vld [vmem:[#allocation10 + $0x18] sm:$0xff]  ;;  %v183_v5 = vld [vmem:[#allocation11 + $0x8] sm:$0xff]  ;;  %v151_v6 = vld [vmem:[#allocation10 + $0x10] sm:$0xff]  ;;  %s267_s14 = sshll.u32 %s648_s8, 4  ;;  %s254_s20 = sshll.u32 %s647_s7, 4  ;;  %s268_s14 = int_to_ptr.hbm [resolvable:$true] %s267_s14  ;;  %s255_s20 = int_to_ptr.hbm [resolvable:$true] %s254_s20 }
  0x16   :  { %99 = vst.msk [vmem:[#allocation2] sm:$0xff] %vm98_vm0, %v511_v0  ;;  %v112_v4 = vld [vmem:[#allocation8 + $0x18] sm:$0xff]  ;;  %165 = vmatpush.msra.mxu1 %v152_v3  ;;  %v111_v7 = vld [vmem:[#allocation8 + $0x10] sm:$0xff]  ;;  %v150_v8 = vld [vmem:[#allocation10 + $0x8] sm:$0xff]  ;;  %s514_s8 = smov [#allocation16]   ;;  %s280_s0 = sshll.u32 %s649_s9, 4  ;;  %s281_s0 = int_to_ptr.hbm [resolvable:$true] %s280_s0 }
  0x17   :  { %100 = vst.msk [vmem:[#allocation2 + $0x8] sm:$0xff] %vm98_vm0, %v511_v0  ;;  %310 = vmatpush.msra.mxu3 %v112_v4  ;;  %199 = vmatpush.msra.mxu2 %v184_v2  ;;  %v110_v9 = vld [vmem:[#allocation8 + $0x8] sm:$0xff]  ;;  %v182_v10 = vld [vmem:[#allocation11] sm:$0xff]  ;;  %v105_v11 = vld [vmem:[#allocation5] sm:$0xff]  ;;  %s278_s21 = sshll.u32 %s514_s8, 4  ;;  %s279_s21 = int_to_ptr.vmem [resolvable:$true] %s278_s21 }
  0x18   :  { %102 = vst.msk [vmem:[#allocation3 + $0x8] sm:$0xff] %vm98_vm0, %v511_v0  ;;  %132 = vmatpush.msra.mxu0 %v112_v4  ;;  %166 = vmatpush.msra.mxu1 %v151_v6  ;;  %v149_v12 = vld [vmem:[#allocation10] sm:$0xff]  ;;  %v106_v14 = vld [vmem:[#allocation5 + $0x8] sm:$0xff] }
  0x19   :  { %103 = vst.msk [vmem:[#allocation4] sm:$0xff] %vm98_vm0, %v511_v0  ;;  %311 = vmatpush.msra.mxu3 %v111_v7  ;;  %200 = vmatpush.msra.mxu2 %v183_v5  ;;  %v109_v13 = vld [vmem:[#allocation8] sm:$0xff] }
  0x1a   :  { %104 = vst.msk [vmem:[#allocation4 + $0x8] sm:$0xff] %vm98_vm0, %v511_v0  ;;  %133 = vmatpush.msra.mxu0 %v111_v7  ;;  %167 = vmatpush.msra.mxu1 %v150_v8  ;;  %v324_v27 = vld [vmem:[%s645_s5] ss:$0 sm:$0xff] }
  0x1b   :  { %312 = vmatpush.msra.mxu3 %v110_v9  ;;  %201 = vmatpush.msra.mxu2 %v182_v10  ;;  %v325_v31 = vld [vmem:[%s644_s4] ss:$0 sm:$0xff]  ;;  %s512_s4 = smov [#allocation14]  }
  0x1c   :  { %134 = vmatpush.msra.mxu0 %v110_v9  ;;  %308 = vmatmul.msk.f32.vlgmr.msra.gmra.mxu2 %vm98_vm0, %v105_v11  ;;  %v147_v15 = vld [vmem:[#allocation3] sm:$0xff]  ;;  %v326_v36 = vld [vmem:[%s646_s6] ss:$0 sm:$0xff]  ;;  %s265_s5 = sshll.u32 %s512_s4, 4  ;;  %s513_s6 = smov [#allocation13]   ;;  %s266_s5 = int_to_ptr.vmem [resolvable:$true] %s265_s5 }
  0x1d   :  { %168 = vmatpush.msra.mxu1 %v149_v12  ;;  %313 = vmatpush.msra.mxu3 %v109_v13  ;;  %v107_v17 = vld [vmem:[#allocation2] sm:$0xff]  ;;  %s252_s15 = sshll.u32 %s513_s6, 4  ;;  %s253_s15 = int_to_ptr.vmem [resolvable:$true] %s252_s15 }
  0x1e   :  { %306 = vmatmul.msk.f32.vlgmr.msra.gmra.mxu1 %vm98_vm0, %v105_v11  ;;  %305 = vmatmul.msk.f32.vlgmr.msra.gmra.mxu3 %vm98_vm0, %v106_v14  ;;  %v108_v23 = vld [vmem:[#allocation2 + $0x8] sm:$0xff] }
  0x1f   :  { %135 = vmatpush.msra.mxu0 %v109_v13  ;;  %v148_v25 = vld [vmem:[#allocation3 + $0x8] sm:$0xff] }
  0x20   :  { %304 = vmatmul.msk.f32.vlgmr.msra.gmra.mxu0 %vm98_vm0, %v105_v11  ;;  %v180_v20 = vld [vmem:[#allocation4] sm:$0xff] }
  0x21   :  { %v181_v33 = vld [vmem:[#allocation4 + $0x8] sm:$0xff] }
  0x24   :  { %309 = vmatmul.msk.f32.gmra.mxu2 %vm98_vm0, %v106_v14 }
  0x26   :  { %307 = vmatmul.msk.f32.gmra.mxu1 %vm98_vm0, %v106_v14 }
  0x9b   :  { %v170_v16 = vpop.f32.mrf.mxu1 }
  0x9c   :  { %v176_v18 = vadd.f32 %v170_v16, %v147_v15 }
  0x9d   :  { %v137_v19 = vpop.f32.mrf.mxu0 }
  0x9e   :  { %178 = vst.msk [vmem:[#allocation3] sm:$0xff] %vm98_vm0, %v176_v18  ;;  %v143_v21 = vadd.f32 %v137_v19, %v107_v17 }
  0x9f   :  { %v203_v22 = vpop.f32.mrf.mxu2 }
  0xa0   :  { %145 = vst.msk [vmem:[#allocation2] sm:$0xff] %vm98_vm0, %v143_v21  ;;  %v209_v24 = vadd.f32 %v203_v22, %v180_v20 }
  0xa1   :  { %v140_v26 = vpop.f32.mrf.mxu3 }
  0xa2   :  { %211 = vst.msk [vmem:[#allocation4] sm:$0xff] %vm98_vm0, %v209_v24  ;;  %v144_v28 = vadd.f32 %v140_v26, %v108_v23 }
  0xa3   :  { %v173_v29 = vpop.f32.mrf.mxu1 }
  0xa4   :  { %v177_v30 = vadd.f32 %v173_v29, %v148_v25  ;;  %146 = vst.msk [vmem:[#allocation2 + $0x8] sm:$0xff] %vm98_vm0, %v144_v28 }
  0xa5   :  { %v228_v32 = vld [vmem:[#allocation3] sm:$0xff] }
  0xa6   :  { %179 = vst.msk [vmem:[#allocation3 + $0x8] sm:$0xff] %vm98_vm0, %v177_v30  ;;  %v234_v34 = vadd.f32 %v324_v27, %v228_v32 }
  0xa7   :  { %v216_v35 = vld [vmem:[#allocation2] sm:$0xff]  ;;  %v206_v37 = vpop.f32.mrf.mxu2 }
  0xa8   :  { %236 = vst.msk [vmem:[#allocation14] sm:$0xff] %vm98_vm0, %v234_v34  ;;  %v222_v38 = vadd.f32 %v325_v31, %v216_v35  ;;  %v210_v39 = vadd.f32 %v206_v37, %v181_v33 }
  0xa9   :  { %v238_v41 = vld [vmem:[#allocation4] sm:$0xff] }
  0xaa   :  { %v224_v40 = vmul.f32 0.35355338, %v222_v38  ;;  %212 = vst.msk [vmem:[#allocation4 + $0x8] sm:$0xff] %vm98_vm0, %v210_v39  ;;  %v244_v42 = vadd.f32 %v326_v36, %v238_v41 }
  0xab   :  { %v217_v43 = vld [vmem:[#allocation2 + $0x8] sm:$0xff] }
  0xac   :  { %226 = vst.msk [vmem:[#allocation13] sm:$0xff] %vm98_vm0, %v224_v40  ;;  %v223_v45 = vadd.f32 %v325_v31, %v217_v43 }
  0xad   :  { %v229_v44 = vld [vmem:[#allocation3 + $0x8] sm:$0xff]  ;;  %246 = vst.msk [vmem:[#allocation16] sm:$0xff] %vm98_vm0, %v244_v42 }
  0xae   :  { %v235_v46 = vadd.f32 %v324_v27, %v229_v44  ;;  %v225_v47 = vmul.f32 0.35355338, %v223_v45 }
  0xb0   :  { %237 = vst.msk [vmem:[#allocation14 + $0x8] sm:$0xff] %vm98_vm0, %v235_v46 }
  0xb1   :  { %273 = dma.vmem_to_hbm [thread:$0]  %s266_s5, 256, %s268_s14, [#allocation15], %s506_s17, %s506_s17, %s507_s18   ;;  %227 = vst.msk [vmem:[#allocation13 + $0x8] sm:$0xff] %vm98_vm0, %v225_v47  ;;  %v239_v48 = vld [vmem:[#allocation4 + $0x8] sm:$0xff] }
  0xb2   :  { %260 = dma.vmem_to_hbm [thread:$0]  %s253_s15, 256, %s255_s20, [#allocation7], %s506_s17, %s506_s17, %s507_s18   ;;  %v245_v49 = vadd.f32 %v326_v36, %v239_v48 }
  0xb4   :  { %247 = vst.msk [vmem:[#allocation16 + $0x8] sm:$0xff] %vm98_vm0, %v245_v49 }
  0xb5   :  { %286 = dma.vmem_to_hbm [thread:$0]  %s279_s21, 256, %s281_s0, [#allocation15], %s506_s17, %s506_s17, %s507_s18  }
  0xb6   :  { %501 = dma.done.wait [#allocation7], 256  }
  0xb7   :  { %502 = vsyncadd [#allocation7], 4294967040 }
  0xb8   :  { %503 = dma.done.wait [#allocation15], 512  }
  0xb9   :  { %504 = vsyncadd [#allocation15], 4294966784 }
  0xba   :  { %299 = vsyncpa [#allocation6], 1 }
  0xbb   :  { %300 = vsyncpa [#allocation9], 1 }
  0xbc   :  { %301 = vsyncpa [#allocation12], 1 }
  0xbd   :  { %302 = vsyncpa [#allocation7], 1 }
  0xbe   :  { %303 = vsyncpa [#allocation15], 1 }

</bundles_post_ra>
